<compile_context>
chip_gen: v5e
topology: v5e:2x2
jax: 0.10.0
libtpu: 0.0.40
codegen_flags: <defaults>
</compile_context>

<pallas_src>
import jax
import jax.numpy as jnp
from jax.experimental import pallas as pl
from jax.experimental.pallas import tpu as pltpu


# ---------------------------------------------------------------------------
# Kernel
# ---------------------------------------------------------------------------
def _patch_embed_kernel(p_ref, w_ref, pe_ref, o_ref):
    # p_ref : (1, tm, K_pad)  flattened patch pixels (one batch elem, one row tile)
    # w_ref : (K_pad, D)      full projection weight -> VMEM-resident (constant index)
    # pe_ref: (tm, D)         f32 sincos pos-embed + conv bias (pre-folded)
    # o_ref : (1, tm, D)
    acc = jnp.dot(p_ref[0], w_ref[...], preferred_element_type=jnp.float32)
    o_ref[0] = (acc + pe_ref[...]).astype(o_ref.dtype)


# ---------------------------------------------------------------------------
# Tiling helpers
# ---------------------------------------------------------------------------
def _round_up(x, m):
    return (x + m - 1) // m * m


def _choose_row_tile(n, target=512):
    """Return (tm, n_padded): row tile (multiple of 8, <= target) and padded N."""
    if n <= target:
        tm = _round_up(n, 8)
        return tm, tm
    best_tm, best_pad = None, None
    for tm in range(target, 255, -8):            # prefer 256..512-row tiles
        n_pad = _round_up(n, tm)
        if best_pad is None or n_pad < best_pad:
            best_tm, best_pad = tm, n_pad
    return best_tm, best_pad


# ---------------------------------------------------------------------------
# Pallas wrapper: fused patch-projection + bias + pos-embed add
# ---------------------------------------------------------------------------
def patch_embed_tokens(patches, w_mat, pos_bias, tm, *, out_dtype=jnp.bfloat16):
    """patches: (B, N_pad, K_pad); w_mat: (K_pad, D); pos_bias: (N_pad, D) f32."""
    B, N_pad, K_pad = patches.shape
    D = w_mat.shape[1]
    assert N_pad % tm == 0 and pos_bias.shape == (N_pad, D)
    grid = (N_pad // tm, B)    # batch innermost: W / pos_bias indices don't change fast

    return pl.pallas_call(
        _patch_embed_kernel,
        out_shape=jax.ShapeDtypeStruct((B, N_pad, D), out_dtype),
        grid_spec=pltpu.PrefetchScalarGridSpec(
            num_scalar_prefetch=0,
            grid=grid,
            in_specs=[
                pl.BlockSpec((1, tm, K_pad), lambda i, b: (b, i, 0)),  # streamed
                pl.BlockSpec((K_pad, D), lambda i, b: (0, 0)),         # fetched once
                pl.BlockSpec((tm, D), lambda i, b: (i, 0)),            # once per row tile
            ],
            out_specs=pl.BlockSpec((1, tm, D), lambda i, b: (b, i, 0)),
        ),
        compiler_params=pltpu.CompilerParams(
            dimension_semantics=("parallel", "parallel"),
            allow_input_fusion=[True, False, False],
        ),
    )(patches, w_mat, pos_bias)


# ---------------------------------------------------------------------------
# SinCos positional embedding (faithful translation of SinCosPosEmbed)
# ---------------------------------------------------------------------------
def sincos_pos_embed(h, w, embed_dim, cls_token=False):
    # Module only asserts % 2, but the construction requires % 4 for the table
    # width to equal embed_dim (review correctness concern).
    assert embed_dim % 4 == 0, embed_dim
    d4 = (embed_dim // 2) // 2
    omega = jnp.arange(d4, dtype=jnp.float32) / ((embed_dim // 2) / 2.0)
    omega = 1.0 / (10000.0 ** omega)

    gw = jnp.arange(w, dtype=jnp.float32)
    gh = jnp.arange(h, dtype=jnp.float32)
    X, Y = jnp.meshgrid(gw, gh, indexing="xy")          # each (h, w)

    def emb1d(pos):
        out = pos.reshape(-1)[:, None] * omega[None, :]  # (h*w, d4)
        return jnp.concatenate([jnp.sin(out), jnp.cos(out)], axis=1)

    pe = jnp.concatenate([emb1d(X), emb1d(Y)], axis=1)   # (h*w, embed_dim)
    if cls_token:
        pe = jnp.concatenate([jnp.zeros((1, embed_dim), jnp.float32), pe], 0)
    return pe


# ---------------------------------------------------------------------------
# Precompute (hoisted out of the per-forward path)
# ---------------------------------------------------------------------------
def prepare_vit_preprocessor(conv_w, conv_b, img_size, patch_size,
                             *, compute_dtype=jnp.bfloat16):
    """conv_w: (D, C, ph, pw); conv_b: (D,).  Returns constants for the forward."""
    H, W = img_size
    ph, pw = patch_size
    Hn, Wn = H // ph, W // pw
    N = Hn * Wn
    D, C = conv_w.shape[0], conv_w.shape[1]
    K = C * ph * pw
    K_pad = _round_up(K, 128)                 # lane-/MXU-friendly contraction dim
    tm, N_pad = _choose_row_tile(N)

    # Conv weight -> (K, D) GEMM weight, same (c, kh, kw) flatten order as the
    # patch extraction in the forward; zero-pad the contraction dim.
    w_mat = conv_w.reshape(D, K).T.astype(compute_dtype)
    w_mat = jnp.pad(w_mat, ((0, K_pad - K), (0, 0)))

    # Fold the conv bias into the positional-embedding table (one fused add).
    pos_bias = sincos_pos_embed(Hn, Wn, D) + conv_b[None, :].astype(jnp.float32)
    pos_bias = jnp.pad(pos_bias, ((0, N_pad - N), (0, 0)))

    return dict(w_mat=w_mat, pos_bias=pos_bias, patch_size=(ph, pw),
                grid_size=(Hn, Wn), tokens=N, n_pad=N_pad, k=K, k_pad=K_pad,
                tm=tm, compute_dtype=compute_dtype)


# ---------------------------------------------------------------------------
# ViTPreprocessor forward (defaults: no cls token, no patch dropping)
# ---------------------------------------------------------------------------
def vit_preprocessor_forward(x, params, *, out_dtype=jnp.bfloat16):
    """x: (B, C, H, W) -> tokens (B, N, D)."""
    B, C, H, W = x.shape
    ph, pw = params["patch_size"]
    Hn, Wn = params["grid_size"]
    N, N_pad = params["tokens"], params["n_pad"]
    K, K_pad = params["k"], params["k_pad"]

    # Cast BEFORE the rearrange so any materialized patches intermediate is
    # written/read at half width (and is fusible into the pallas operand).
    xc = x.astype(params["compute_dtype"])
    patches = (xc.reshape(B, C, Hn, ph, Wn, pw)
                 .transpose(0, 2, 4, 1, 3, 5)
                 .reshape(B, N, K))
    patches = jnp.pad(patches, ((0, 0), (0, N_pad - N), (0, K_pad - K)))

    out = patch_embed_tokens(patches, params["w_mat"], params["pos_bias"],
                             params["tm"], out_dtype=out_dtype)
    return out[:, :N] if N_pad != N else out


# ---------------------------------------------------------------------------
# References for verification
# ---------------------------------------------------------------------------
def reference_matmul(x, conv_w, conv_b, patch_size):
    """Same math path as the kernel, pure JAX f32 (tight tolerance check)."""
    B, C, H, W = x.shape
    ph, pw = patch_size
    Hn, Wn = H // ph, W // pw
    N, D, K = Hn * Wn, conv_w.shape[0], C * ph * pw
    patches = (x.reshape(B, C, Hn, ph, Wn, pw)
                 .transpose(0, 2, 4, 1, 3, 5)
                 .reshape(B, N, K))
    w_mat = conv_w.reshape(D, K).T
    pe = sincos_pos_embed(Hn, Wn, D)
    return jnp.einsum("bnk,kd->bnd", patches, w_mat) + conv_b[None, None, :] + pe[None]


def reference_conv(x, conv_w, conv_b, patch_size):
    """Direct conv2d reference matching the PyTorch module (loose tolerance)."""
    ph, pw = patch_size
    y = jax.lax.conv_general_dilated(
        x, conv_w, window_strides=(ph, pw), padding="VALID",
        dimension_numbers=("NCHW", "OIHW", "NCHW"))
    y = y + conv_b[None, :, None, None]
    B, D, Hn, Wn = y.shape
    tokens = y.reshape(B, D, Hn * Wn).transpose(0, 2, 1)
    return tokens + sincos_pos_embed(Hn, Wn, D)[None]


# ---------------------------------------------------------------------------
if __name__ == "__main__":
    # Small, structure-preserving configuration.
    B, C, H, W = 2, 3, 32, 32
    patch = 8                      # N = (32/8)^2 = 16 tokens, K = 192 (padded to 256)
    embed_dim = 256                # multiple of 128 -> lane-dense output

    key = jax.random.PRNGKey(0)
    kx, kw, kb = jax.random.split(key, 3)
    x = jax.random.normal(kx, (B, C, H, W), jnp.float32)

    K = C * patch * patch
    limit = float(jnp.sqrt(6.0 / (K + embed_dim)))    # xavier_uniform on flattened weight
    conv_w = jax.random.uniform(kw, (embed_dim, C, patch, patch), jnp.float32, -limit, limit)
    bscale = 1.0 / float(K) ** 0.5
    conv_b = jax.random.uniform(kb, (embed_dim,), jnp.float32, -bscale, bscale)

    ref_mm = reference_matmul(x, conv_w, conv_b, (patch, patch))
    ref_conv = reference_conv(x, conv_w, conv_b, (patch, patch))

    # f32 compute path: tight check against the identical math path.
    p32 = prepare_vit_preprocessor(conv_w, conv_b, (H, W), (patch, patch),
                                   compute_dtype=jnp.float32)
    out32 = jax.block_until_ready(
        vit_preprocessor_forward(x, p32, out_dtype=jnp.float32))
    assert out32.shape == (B, (H // patch) * (W // patch), embed_dim)
    assert jnp.allclose(out32, ref_mm, atol=1e-4, rtol=1e-4), \
        float(jnp.max(jnp.abs(out32 - ref_mm)))
    # Conv-based reference guards the patch-extraction / weight-flatten order.
    assert jnp.allclose(out32, ref_conv, atol=1e-2, rtol=1e-2), \
        float(jnp.max(jnp.abs(out32 - ref_conv)))

    # Production default: bf16 MXU inputs + bf16 output, f32 accumulation in-kernel.
    pbf = prepare_vit_preprocessor(conv_w, conv_b, (H, W), (patch, patch))
    outbf = jax.block_until_ready(vit_preprocessor_forward(x, pbf))
    assert outbf.dtype == jnp.bfloat16
    assert jnp.allclose(outbf.astype(jnp.float32), ref_mm, atol=0.1, rtol=0.1)

    print("KERNEL_OK")
</pallas_src>

<mosaic_0001>
module attributes {stable_mosaic.version = 11 : i64} {
  func.func @_patch_embed_kernel(%arg0: i32, %arg1: i32, %arg2: memref<1x16x256xf32, #tpu.memory_space<vmem>>, %arg3: memref<256x256xf32, #tpu.memory_space<vmem>>, %arg4: memref<16x256xf32, #tpu.memory_space<vmem>>, %arg5: memref<1x16x256xf32, #tpu.memory_space<vmem>>) attributes {dimension_semantics = [#tpu.dimension_semantics<parallel>, #tpu.dimension_semantics<parallel>], iteration_bounds = array<i64: 1, 2>, scalar_prefetch = 0 : i64, scratch_operands = 0 : i64, tpu.core_type = #tpu.core_type<tc>, window_params = [{transform_indices = @transform_0, window_bounds = array<i64: 1, 16, 256>}, {pipeline_mode = #tpu.pipeline_mode<synchronous>, transform_indices = @transform_1, window_bounds = array<i64: 256, 256>}, {transform_indices = @transform_2, window_bounds = array<i64: 16, 256>}, {transform_indices = @transform_3, window_bounds = array<i64: 1, 16, 256>}]} {
    %c0 = arith.constant 0 : index
    %c0_0 = arith.constant 0 : index
    %c0_1 = arith.constant 0 : index
    %0 = vector.load %arg2[%c0, %c0_0, %c0_1] : memref<1x16x256xf32, #tpu.memory_space<vmem>>, vector<1x16x256xf32>
    %1 = vector.shape_cast %0 : vector<1x16x256xf32> to vector<16x256xf32>
    %c0_2 = arith.constant 0 : index
    %c0_3 = arith.constant 0 : index
    %2 = vector.load %arg3[%c0_2, %c0_3] : memref<256x256xf32, #tpu.memory_space<vmem>>, vector<256x256xf32>
    %cst = arith.constant dense<0.000000e+00> : vector<16x256xf32>
    %3 = tpu.matmul %1, %2, %cst {dimension_numbers = #tpu.dot_dimension_numbers<[1], [0], [0], [1], [0, 0, 1, 1], [], []>} : vector<16x256xf32>, vector<256x256xf32>, vector<16x256xf32> -> vector<16x256xf32>
    %c0_4 = arith.constant 0 : index
    %c0_5 = arith.constant 0 : index
    %4 = vector.load %arg4[%c0_4, %c0_5] : memref<16x256xf32, #tpu.memory_space<vmem>>, vector<16x256xf32>
    %5 = arith.addf %3, %4 : vector<16x256xf32>
    %c0_6 = arith.constant 0 : index
    %c0_7 = arith.constant 0 : index
    %c0_8 = arith.constant 0 : index
    %6 = vector.load %arg5[%c0_6, %c0_7, %c0_8] : memref<1x16x256xf32, #tpu.memory_space<vmem>>, vector<1x16x256xf32>
    %7 = vector.shape_cast %6 : vector<1x16x256xf32> to vector<16x256xf32>
    %8 = vector.shape_cast %5 : vector<16x256xf32> to vector<1x16x256xf32>
    tpu.vector_store %arg5[%c0_6, %c0_7, %c0_8], %8 {strides = array<i32>} : memref<1x16x256xf32, #tpu.memory_space<vmem>>, vector<1x16x256xf32>,
    return
  }
  func.func @transform_0(%arg0: i32, %arg1: i32) -> (i32, i32, i32) {
    %c0_i32 = arith.constant 0 : i32
    %c0_i32_0 = arith.constant 0 : i32
    return %arg1, %arg0, %c0_i32 : i32, i32, i32
  }
  func.func @transform_1(%arg0: i32, %arg1: i32) -> (i32, i32) {
    %c0_i32 = arith.constant 0 : i32
    %c0_i32_0 = arith.constant 0 : i32
    %c0_i32_1 = arith.constant 0 : i32
    return %c0_i32, %c0_i32_0 : i32, i32
  }
  func.func @transform_2(%arg0: i32, %arg1: i32) -> (i32, i32) {
    %c0_i32 = arith.constant 0 : i32
    %c0_i32_0 = arith.constant 0 : i32
    return %arg0, %c0_i32 : i32, i32
  }
  func.func @transform_3(%arg0: i32, %arg1: i32) -> (i32, i32, i32) {
    %c0_i32 = arith.constant 0 : i32
    %c0_i32_0 = arith.constant 0 : i32
    return %arg1, %arg0, %c0_i32 : i32, i32, i32
  }
}

</mosaic_0001>

<bundles_post_ra>
// kernel: tpu_custom_call.1
= control target key start
LH: loop header
LB: loop body
LE: loop exit
PB: predicated region body
PF: predicated region fallthrough
CT: control target
= control target key end

     0   :  { %8 = vsyncpa [#allocation3], 0  ;;  %s1027_s0 = inlined_call_operand.hbm [shape: f32[2,16,256], index: 0, kind: input, shape index: {}]   ;;  %s1028_s1 = inlined_call_operand.hbm [shape: f32[256,256], index: 1, kind: input, shape index: {}]   ;;  %s1029_s2 = inlined_call_operand.hbm [shape: f32[16,256], index: 2, kind: input, shape index: {}]   ;;  %s1030_s3 = inlined_call_operand.hbm [shape: f32[2,16,256], index: 3, kind: output, shape index: {}]  }
   0x1   :  { %10 = vsyncpa [#allocation3 + $0x1], 0 }
   0x2   :  { %11 = vsyncpa [#allocation6], 0 }
   0x3   :  { %12 = vsyncpa [#allocation4], 0 }
   0x4   :  { %14 = vsyncpa [#allocation4 + $0x1], 0  ;;  %s862_s12 = smov 0   ;;  %s864_s13 = smov 0  }
   0x5   :  { %s866_s14 = smov 0   ;;  %s868_s15 = smov 0  }
   0x6   :  { %s870_s16 = smov 0   ;;  %s872_s17 = smov 0  }
   0x7 LB: > { %s550_s18 = sadd.s32 4294967295, %s834_s17   ;;  %s551_s19 = sadd.s32 4294967294, %s834_s17   ;;  %s834_s17 = sphi %s872_s17, %s20_s17   ;;  %s830_s16 = sphi %s870_s16, %s1040_s16   ;;  %s826_s15 = sphi %s868_s15, %s1039_s15   ;;  %s822_s14 = sphi %s866_s14, %s1038_s14   ;;  %s818_s13 = sphi %s864_s13, %s1037_s13   ;;  %s814_s12 = sphi %s862_s12, %s1036_s12  }
   0x8   : > { %p54_p0 = scmp.ne.s32.totalorder %s818_s13, %s814_s12  ;;  %p898_p1 = scmp.eq.s32.totalorder %s550_s18, 0 }
   0x9   : > { %p133_p2 = scmp.eq.s32.totalorder %s551_s19, 1  ;;  %p552_p4 = scmp.ge.s32.totalorder %s834_s17, 1 }
   0xa   : > { %p904_p3 = por %p898_p1, %p54_p0  ;;  %p140_p6 = scmp.lt.s32.totalorder %s834_s17, 3 }
   0xb   : > { %p909_p5 = por %p133_p2, %p54_p0  ;;  %s151_s25 = sshll.u32 %s1028_s1, 4  ;;  %s152_s25 = int_to_ptr.hbm [resolvable:$true] %s151_s25 }
   0xc   : > { %p917_p7 = pnand %p552_p4, %p140_p6  ;;  %s836_s27 = smov [#allocation5]  }
   0xd   : > { %s153_s28 = sshll.u32 %s836_s27, 4  ;;  %p555_p10 = scmp.ge.s32.totalorder %s834_s17, 2  ;;  %s154_s28 = int_to_ptr.vmem [resolvable:$true] %s153_s28 }
   0xe   : > { %p583_p8 = pneg %p917_p7  ;;  %s169_s4 = sshll.u32 %s1029_s2, 4  ;;  %s170_s4 = int_to_ptr.hbm [resolvable:$true] %s169_s4 }
   0xf   : > { %s837_s5 = smov 256   ;;  %s838_s6 = smov 16  }
  0x10   : > { %p584_p9 = pnand %p583_p8, %p898_p1  ;;  %s839_s7 = smov [#allocation7]  }
  0x11   : > { %s171_s8 = sshll.u32 %s839_s7, 4  ;;  %p127_p11 = scmp.eq.s32.totalorder %s550_s18, 1  ;;  %s172_s8 = int_to_ptr.vmem [resolvable:$true] %s171_s8 }
  0x12   : > { %586 = dma.hbm_to_vmem [thread:$0]  (!%p584_p9), %s152_s25, 8192, %s154_s28, [#allocation6], %s837_s5, %s837_s5, %s838_s6  }
  0x13   : > { %589 = dma.hbm_to_vmem [thread:$0]  (!%p584_p9), %s170_s4, 512, %s172_s8, [#allocation6], %s837_s5, %s837_s5, %s838_s6  }
  0x14   : > { %s29_s9 = sadd.s32 1, %s830_s16  ;;  %s41_s10 = sadd.s32 1, %s822_s14 }
  0x15   : > { %p30_p12 = scmp.ge.s32.totalorder %s29_s9, 2  ;;  %p48_p13 = scmp.ne.s32.totalorder %s822_s14, %s818_s13 }
  0x16   : > { %p49_p0 = scmp.eq.s32.totalorder %s834_s17, 0  ;;  %p600_p4 = scmp.lt.s32.totalorder %s834_s17, 2 }
  0x17   : > { %s1042_s9 = smov (%p30_p12, %s29_s9), 0  ;;  %p944_p2 = por %p127_p11, %p48_p13 }
  0x18   : > { %s36_s19 = ssub.s32 %s830_s16, %s1042_s9  ;;  %s185_s23 = sand.u32 1, %s822_s14  }
  0x19   : > { %p39_p6 = scmp.eq.s32.totalorder %s36_s19, 0  ;;  %p50_p8 = por %p49_p0, %p48_p13 }
  0x1a   : > { %s556_s24 = sshll.u32 %s185_s23, 5  ;;  %s569_s18 = sshll.u32 %s830_s16, 5 }
  0x1b   : > { %s954_s25 = scalar_select %p39_p6, %s822_s14, %s41_s10  }
  0x1c   : > { %s197_s29 = scalar_lea.hbm %s1027_s0, %s569_s18  ;;  %s189_s4 = scalar_lea.vmem [#allocation2], %s556_s24 }
  0x1d   : > { %s198_s30 = sshll.u32 %s197_s29, 4  ;;  %s200_s7 = sshll.u32 %s189_s4, 4  ;;  %s199_s30 = int_to_ptr.hbm [resolvable:$true] %s198_s30  ;;  %s201_s7 = int_to_ptr.vmem [resolvable:$true] %s200_s7 }
  0x1e   : > { %p591_p9 = pnand %p600_p4, %p50_p8  ;;  %s186_s8 = scalar_lea.sflag [#allocation3], %s185_s23 }
  0x1f   : > { %212 = sbr.rel (%p917_p7) target bundleno = 219 (0xdb), region = 32  ;;  %s967_s10 = sand.u32 (!%p917_p7), 1, %s818_s13  }
  0x20   : > { %593 = dma.hbm_to_vmem [thread:$0]  (!%p591_p9), %s199_s30, 512, %s201_s7, %s186_s8, %s837_s5, %s837_s5, %s838_s6  }
  0x21   : > { %s560_s19 = sshll.u32 (!%p917_p7), %s967_s10, 5  ;;  %s215_s24 = scalar_lea.sflag (!%p917_p7), [#allocation3], %s967_s10 }
  0x22   : > { %s973_s18 = scalar_lea.vmem (!%p917_p7), [#allocation2], %s560_s19 }
  0x24   : > { %801 = dma.done.wait (%p904_p3), %s215_s24, 512  }
  0x25   : > { %803 = vsyncadd (%p904_p3), %s215_s24, 4294966784 }
  0x26   : > { %805 = dma.done.wait (%p898_p1), [#allocation6], 8704  }
  0x27   : > { %807 = vsyncadd (%p898_p1), [#allocation6], 4294958592  ;;  %v290_v0 = vld [vmem:[#allocation5 + $0xf8] sm:$0xff]  ;;  %v288_v1 = vld [vmem:[#allocation5 + $0xe8] sm:$0xff]  ;;  %s251_s20 = scalar_lea.vmem [#allocation8], %s560_s19  ;;  %s570_s21 = sshll.u32 %s826_s15, 5 }
  0x28   : > { %v322_v2 = vld [vmem:[#allocation5 + $0x1f8] sm:$0xff]  ;;  %373 = vmatpush.msra.mxu2 %v290_v0  ;;  %v320_v3 = vld [vmem:[#allocation5 + $0x1e8] sm:$0xff]  ;;  %v289_v4 = vld [vmem:[#allocation5 + $0xf0] sm:$0xff]  ;;  %s438_s6 = scalar_lea.hbm %s1030_s3, %s570_s21  ;;  %s439_s23 = sshll.u32 %s251_s20, 4  ;;  %s440_s23 = int_to_ptr.vmem [resolvable:$true] %s439_s23 }
  0x29   : > { %396 = vmatpush.msra.mxu3 %v322_v2  ;;  %v286_v5 = vld [vmem:[#allocation5 + $0xd8] sm:$0xff]  ;;  %327 = vmatpush.msra.mxu0 %v289_v4  ;;  %v287_v7 = vld [vmem:[#allocation5 + $0xe0] sm:$0xff]  ;;  %v284_v8 = vld [vmem:[#allocation5 + $0xc8] sm:$0xff]  ;;  %s441_s27 = sshll.u32 %s438_s6, 4  ;;  %s424_s15 = scalar_lea.sflag [#allocation4], %s967_s10  ;;  %s442_s27 = int_to_ptr.hbm [resolvable:$true] %s441_s27 }
  0x2a   : > { %v318_v6 = vld [vmem:[#allocation5 + $0x1d8] sm:$0xff]  ;;  %374 = vmatpush.msra.mxu2 %v288_v1  ;;  %v321_v9 = vld [vmem:[#allocation5 + $0x1f0] sm:$0xff]  ;;  %v316_v10 = vld [vmem:[#allocation5 + $0x1c8] sm:$0xff]  ;;  %s762_s28 = sshra.s32 %s442_s27, 4  ;;  %s768_s7 = scalar_lea.hbm %s1030_s3, 64  ;;  %s763_s28 = int_to_ptr.hbm [resolvable:$true] %s762_s28 }
  0x2b   : > { %397 = vmatpush.msra.mxu3 %v320_v3  ;;  %328 = vmatpush.msra.mxu0 %v287_v7  ;;  %v285_v11 = vld [vmem:[#allocation5 + $0xd0] sm:$0xff]  ;;  %v319_v12 = vld [vmem:[#allocation5 + $0x1e0] sm:$0xff]  ;;  %v282_v15 = vld [vmem:[#allocation5 + $0xb8] sm:$0xff]  ;;  %s764_s29 = scalar_lea.hbm %s763_s28, 32  ;;  %p769_p11 = scmp.lt.s32.totalorder %s763_s28, %s1030_s3 }
  0x2c   : > { %350 = vmatpush.msra.mxu1 %v321_v9  ;;  %375 = vmatpush.msra.mxu2 %v286_v5  ;;  %v283_v13 = vld [vmem:[#allocation5 + $0xc0] sm:$0xff]  ;;  %v317_v14 = vld [vmem:[#allocation5 + $0x1d0] sm:$0xff]  ;;  %v314_v16 = vld [vmem:[#allocation5 + $0x1b8] sm:$0xff]  ;;  %p765_p1 = scmp.ne.s32.totalorder %s763_s28, %s764_s29  ;;  %p770_p12 = scmp.lt.s32.totalorder %s768_s7, %s764_s29 }
  0x2d   : > { %398 = vmatpush.msra.mxu3 %v318_v6  ;;  %329 = vmatpush.msra.mxu0 %v285_v11  ;;  %v281_v17 = vld [vmem:[#allocation5 + $0xb0] sm:$0xff]  ;;  %v315_v18 = vld [vmem:[#allocation5 + $0x1c0] sm:$0xff]  ;;  %v280_v19 = vld [vmem:[#allocation5 + $0xa8] sm:$0xff] }
  0x2e   : > { %351 = vmatpush.msra.mxu1 %v319_v12  ;;  %376 = vmatpush.msra.mxu2 %v284_v8  ;;  %v312_v20 = vld [vmem:[#allocation5 + $0x1a8] sm:$0xff]  ;;  %v279_v21 = vld [vmem:[#allocation5 + $0xa0] sm:$0xff]  ;;  %v313_v22 = vld [vmem:[#allocation5 + $0x1b0] sm:$0xff]  ;;  %p766_p3 = pnand %p765_p1, %p944_p2  ;;  %p771_p13 = por %p770_p12, %p769_p11 }
  0x2f   : > { %399 = vmatpush.msra.mxu3 %v316_v10  ;;  %330 = vmatpush.msra.mxu0 %v283_v13  ;;  %v278_v23 = vld [vmem:[#allocation5 + $0x98] sm:$0xff]  ;;  %v277_v25 = vld [vmem:[#allocation5 + $0x90] sm:$0xff]  ;;  %v311_v26 = vld [vmem:[#allocation5 + $0x1a0] sm:$0xff] }
  0x30   : > { %352 = vmatpush.msra.mxu1 %v317_v14  ;;  %377 = vmatpush.msra.mxu2 %v282_v15  ;;  %v310_v24 = vld [vmem:[#allocation5 + $0x198] sm:$0xff]  ;;  %v276_v27 = vld [vmem:[#allocation5 + $0x88] sm:$0xff]  ;;  %v275_v29 = vld [vmem:[#allocation5 + $0x80] sm:$0xff]  ;;  %p767_p7 = pneg %p766_p3 }
  0x31   : > { %400 = vmatpush.msra.mxu3 %v314_v16  ;;  %331 = vmatpush.msra.mxu0 %v281_v17  ;;  %v308_v28 = vld [vmem:[#allocation5 + $0x188] sm:$0xff]  ;;  %v309_v30 = vld [vmem:[#allocation5 + $0x190] sm:$0xff]  ;;  %v274_v31 = vld [vmem:[#allocation5 + $0x78] sm:$0xff] }
  0x32   : > { %353 = vmatpush.msra.mxu1 %v315_v18  ;;  %378 = vmatpush.msra.mxu2 %v280_v19  ;;  %v306_v32 = vld [vmem:[#allocation5 + $0x178] sm:$0xff]  ;;  %v273_v33 = vld [vmem:[#allocation5 + $0x70] sm:$0xff]  ;;  %v307_v34 = vld [vmem:[#allocation5 + $0x180] sm:$0xff]  ;;  %p772_p0 = pnand %p771_p13, %p767_p7 }
  0x33   : > { %401 = vmatpush.msra.mxu3 %v312_v20  ;;  %332 = vmatpush.msra.mxu0 %v279_v21  ;;  %v272_v35 = vld [vmem:[#allocation5 + $0x68] sm:$0xff]  ;;  %v271_v37 = vld [vmem:[#allocation5 + $0x60] sm:$0xff]  ;;  %v305_v38 = vld [vmem:[#allocation5 + $0x170] sm:$0xff] }
  0x34   : > { %354 = vmatpush.msra.mxu1 %v313_v22  ;;  %379 = vmatpush.msra.mxu2 %v278_v23  ;;  %v304_v36 = vld [vmem:[#allocation5 + $0x168] sm:$0xff]  ;;  %v270_v39 = vld [vmem:[#allocation5 + $0x58] sm:$0xff]  ;;  %v269_v41 = vld [vmem:[#allocation5 + $0x50] sm:$0xff] }
  0x35   : > { %402 = vmatpush.msra.mxu3 %v310_v24  ;;  %333 = vmatpush.msra.mxu0 %v277_v25  ;;  %v302_v40 = vld [vmem:[#allocation5 + $0x158] sm:$0xff]  ;;  %v303_v42 = vld [vmem:[#allocation5 + $0x160] sm:$0xff]  ;;  %v268_v43 = vld [vmem:[#allocation5 + $0x48] sm:$0xff] }
  0x36   : > { %355 = vmatpush.msra.mxu1 %v311_v26  ;;  %380 = vmatpush.msra.mxu2 %v276_v27  ;;  %v300_v44 = vld [vmem:[#allocation5 + $0x148] sm:$0xff]  ;;  %v267_v45 = vld [vmem:[#allocation5 + $0x40] sm:$0xff]  ;;  %v301_v46 = vld [vmem:[#allocation5 + $0x150] sm:$0xff] }
  0x37   : > { %403 = vmatpush.msra.mxu3 %v308_v28  ;;  %334 = vmatpush.msra.mxu0 %v275_v29  ;;  %v266_v47 = vld [vmem:[#allocation5 + $0x38] sm:$0xff]  ;;  %v265_v49 = vld [vmem:[#allocation5 + $0x30] sm:$0xff]  ;;  %v299_v50 = vld [vmem:[#allocation5 + $0x140] sm:$0xff] }
  0x38   : > { %356 = vmatpush.msra.mxu1 %v309_v30  ;;  %381 = vmatpush.msra.mxu2 %v274_v31  ;;  %v298_v48 = vld [vmem:[#allocation5 + $0x138] sm:$0xff]  ;;  %v264_v51 = vld [vmem:[#allocation5 + $0x28] sm:$0xff]  ;;  %v263_v53 = vld [vmem:[#allocation5 + $0x20] sm:$0xff] }
  0x39   : > { %404 = vmatpush.msra.mxu3 %v306_v32  ;;  %335 = vmatpush.msra.mxu0 %v273_v33  ;;  %v296_v52 = vld [vmem:[#allocation5 + $0x128] sm:$0xff]  ;;  %v297_v54 = vld [vmem:[#allocation5 + $0x130] sm:$0xff]  ;;  %v262_v55 = vld [vmem:[#allocation5 + $0x18] sm:$0xff] }
  0x3a   : > { %357 = vmatpush.msra.mxu1 %v307_v34  ;;  %382 = vmatpush.msra.mxu2 %v272_v35  ;;  %v294_v56 = vld [vmem:[#allocation5 + $0x118] sm:$0xff]  ;;  %v261_v57 = vld [vmem:[#allocation5 + $0x10] sm:$0xff]  ;;  %v295_v58 = vld [vmem:[#allocation5 + $0x120] sm:$0xff] }
  0x3b   : > { %405 = vmatpush.msra.mxu3 %v304_v36  ;;  %336 = vmatpush.msra.mxu0 %v271_v37  ;;  %v260_v59 = vld [vmem:[#allocation5 + $0x8] sm:$0xff]  ;;  %v255_v61 = vld [vmem:[%s973_s18] sm:$0xff]  ;;  %v293_v0 = vld [vmem:[#allocation5 + $0x110] sm:$0xff] }
  0x3c   : > { %358 = vmatpush.msra.mxu1 %v305_v38  ;;  %383 = vmatpush.msra.mxu2 %v270_v39  ;;  %v292_v60 = vld [vmem:[#allocation5 + $0x108] sm:$0xff]  ;;  %v259_v63 = vld [vmem:[#allocation5] sm:$0xff]  ;;  %v257_v2 = vld [vmem:[%s973_s18 + $0x10] sm:$0xff] }
  0x3d   : > { %406 = vmatpush.msra.mxu3 %v302_v40  ;;  %337 = vmatpush.msra.mxu0 %v269_v41  ;;  %v256_v62 = vld [vmem:[%s973_s18 + $0x8] sm:$0xff]  ;;  %v291_v1 = vld [vmem:[#allocation5 + $0x100] sm:$0xff]  ;;  %v258_v3 = vld [vmem:[%s973_s18 + $0x18] sm:$0xff] }
  0x3e   : > { %359 = vmatpush.msra.mxu1 %v303_v42  ;;  %384 = vmatpush.msra.mxu2 %v268_v43  ;;  %v323_v4 = vld [vmem:[#allocation7] sm:$0xff]  ;;  %v324_v7 = vld [vmem:[#allocation7 + $0x8] sm:$0xff]  ;;  %v325_v13 = vld [vmem:[#allocation7 + $0x10] sm:$0xff] }
  0x3f   : > { %407 = vmatpush.msra.mxu3 %v300_v44  ;;  %338 = vmatpush.msra.mxu0 %v267_v45  ;;  %v326_v17 = vld [vmem:[#allocation7 + $0x18] sm:$0xff] }
  0x40   : > { %360 = vmatpush.msra.mxu1 %v301_v46  ;;  %385 = vmatpush.msra.mxu2 %v266_v47 }
  0x41   : > { %408 = vmatpush.msra.mxu3 %v298_v48  ;;  %339 = vmatpush.msra.mxu0 %v265_v49 }
  0x42   : > { %361 = vmatpush.msra.mxu1 %v299_v50  ;;  %386 = vmatpush.msra.mxu2 %v264_v51 }
  0x43   : > { %409 = vmatpush.msra.mxu3 %v296_v52  ;;  %340 = vmatpush.msra.mxu0 %v263_v53 }
  0x44   : > { %362 = vmatpush.msra.mxu1 %v297_v54  ;;  %387 = vmatpush.msra.mxu2 %v262_v55 }
  0x45   : > { %410 = vmatpush.msra.mxu3 %v294_v56  ;;  %341 = vmatpush.msra.mxu0 %v261_v57 }
  0x46   : > { %363 = vmatpush.msra.mxu1 %v295_v58  ;;  %388 = vmatpush.msra.mxu2 %v260_v59 }
  0x47   : > { %411 = vmatpush.msra.mxu3 %v292_v60  ;;  %389 = vmatmul.f32.vlgmr.msra.gmra.mxu2 %v255_v61 }
  0x48   : > { %412 = vmatmul.f32.vlgmr.msra.gmra.mxu3 %v256_v62  ;;  %342 = vmatpush.msra.mxu0 %v259_v63 }
  0x49   : > { %364 = vmatpush.msra.mxu1 %v293_v0  ;;  %343 = vmatmul.f32.vlgmr.msra.gmra.mxu0 %v255_v61 }
  0x4b   : > { %365 = vmatpush.msra.mxu1 %v291_v1 }
  0x4c   : > { %366 = vmatmul.f32.vlgmr.msra.gmra.mxu1 %v256_v62 }
  0x4f   : > { %392 = vmatmul.f32.gmra.mxu2 %v257_v2 }
  0x50   : > { %415 = vmatmul.f32.gmra.mxu3 %v258_v3 }
  0x51   : > { %346 = vmatmul.f32.gmra.mxu0 %v257_v2 }
  0x54   : > { %369 = vmatmul.f32.gmra.mxu1 %v258_v3 }
  0xc6   : > { %v344_v5 = vpop.f32.mrf.mxu0 }
  0xc7   : > { %v345_v6 = vadd.f32 %v344_v5, %v323_v4 }
  0xc9   : > { %v367_v8 = vpop.f32.mrf.mxu1 }
  0xca   : > { %v368_v9 = vadd.f32 %v367_v8, %v345_v6  ;;  %v390_v10 = vpop.f32.mrf.mxu2 }
  0xcb   : > { %v413_v11 = vpop.f32.mrf.mxu3  ;;  %v391_v12 = vadd.f32 %v390_v10, %v324_v7 }
  0xcc   : > { %419 = vst [vmem:[%s251_s20] sm:$0xff] %v368_v9 }
  0xcd   : > { %v414_v14 = vadd.f32 %v413_v11, %v391_v12 }
  0xce   : > { %v347_v15 = vpop.f32.mrf.mxu0 }
  0xcf   : > { %420 = vst [vmem:[%s251_s20 + $0x8] sm:$0xff] %v414_v14  ;;  %v348_v16 = vadd.f32 %v347_v15, %v325_v13 }
  0xd1   : > { %v370_v18 = vpop.f32.mrf.mxu1 }
  0xd2   : > { %v371_v19 = vadd.f32 %v370_v18, %v348_v16  ;;  %v393_v20 = vpop.f32.mrf.mxu2 }
  0xd3   : > { %v416_v21 = vpop.f32.mrf.mxu3  ;;  %v394_v22 = vadd.f32 %v393_v20, %v326_v17 }
  0xd4   : > { %421 = vst [vmem:[%s251_s20 + $0x10] sm:$0xff] %v371_v19 }
  0xd5   : > { %v417_v23 = vadd.f32 %v416_v21, %v394_v22 }
  0xd7   : > { %422 = vst [vmem:[%s251_s20 + $0x18] sm:$0xff] %v417_v23 }
  0xd8   : > { %775 = shalt.err (!%p772_p0)
}
  0xd9   : > { %s840_s10 = smov 256   ;;  %s841_s24 = smov 16  }
  0xda   : > { %581 = dma.vmem_to_hbm [thread:$0]  (%p944_p2), %s440_s23, 512, %s442_s27, %s424_s15, %s840_s10, %s840_s10, %s841_s24  }
  0xdb PF: > { %s456_s18 = sand.u32 1, %s814_s12   ;;  %p595_p4 = pnand %p555_p10, %p909_p5 }
  0xdc   : > { %s457_s20 = scalar_lea.sflag [#allocation4], %s456_s18 }
  0xdd   : > { %p596_p6 = pneg %p595_p4 }
  0xdf   : > { %809 = dma.done.wait (%p596_p6), %s457_s20, 512  }
  0xe0   : > { %811 = vsyncadd (%p596_p6), %s457_s20, 4294966784  ;;  %s20_s17 = sadd.s32 1, %s834_s17   ;;  %s1036_s12 = smov %s818_s13 }
  0xe1   : > { %p17_p8 = scmp.ge.s32.totalorder %s20_s17, 4   ;;  %s1037_s13 = smov %s822_s14 }
  0xe2   : > { %s1038_s14 = smov %s954_s25  ;;  %s1039_s15 = smov %s830_s16 }
  0xe3   : > { %s1040_s16 = smov %s1042_s9  ;;  %19 = sbr.rel (!%p17_p8) target bundleno = 7 (0x7), region = 86 }
  0xe8   :  { %463 = vsyncpa [#allocation3], 1 }
  0xe9   :  { %465 = vsyncpa [#allocation3 + $0x1], 1 }
  0xea   :  { %466 = vsyncpa [#allocation6], 1 }
  0xeb   :  { %467 = vsyncpa [#allocation4], 1 }
  0xec   :  { %469 = vsyncpa [#allocation4 + $0x1], 1 }

</bundles_post_ra>
